<compile_context>
chip_gen: v7x
topology: tpu7x:2x2x1
jax: 0.10.0
libtpu: 0.0.40
codegen_flags: <defaults>
</compile_context>

<pallas_src>
import jax
import jax.numpy as jnp
import numpy as np
from jax.experimental import pallas as pl
from jax.experimental.pallas import tpu as pltpu

EPS = 1e-5


def _conv_rows(src_ref, w_ref, H, M, K):
    """Sum of 3 MXU matmuls, one per kernel row dy.

    src_ref: (nb, H+2, K) lane-merged activation with zero dy-halo rows 0, H+1
    w_ref  : (3, K, N)    banded (dx + zero-pad folded in) weights, bf16
    returns: (M, N) f32 accumulator, M = nb*H
    """
    acc = jnp.dot(src_ref[:, 0:H, :].reshape(M, K), w_ref[0],
                  preferred_element_type=jnp.float32)
    for dy in (1, 2):
        acc = acc + jnp.dot(src_ref[:, dy:dy + H, :].reshape(M, K), w_ref[dy],
                            preferred_element_type=jnp.float32)
    return acc


def _double_conv_kernel(x_ref, w1_ref, sh1_ref, w2_ref, sh2_ref, o_ref, mid_ref):
    """One batch-block per grid step.  All activations are lane-merged (W*C lanes).

    x_ref  : (nb, H+2, W*Cin)    bf16, rows 0 and H+1 are the zero dy-halo
    w1_ref : (3, W*Cin, W*Cmid)  bf16 banded weights (BN1 scale folded in)
    sh1_ref: (1, W*Cmid)         f32 fused conv-bias + BN1 shift, tiled over w
    w2_ref : (3, W*Cmid, W*Cout) bf16 banded weights (BN2 scale folded in)
    sh2_ref: (1, W*Cout)         f32
    o_ref  : (nb, H, W*Cout)     lane-dense output
    mid_ref: (nb, H+2, W*Cmid)   bf16 scratch with zero dy-halo rows
    """
    nb, hp2, wcin = x_ref.shape
    H = hp2 - 2
    wcmid = mid_ref.shape[-1]
    wcout = o_ref.shape[-1]
    M = nb * H

    # ---- conv1: 3 accumulating MXU matmuls + (shift, ReLU) epilogue ----
    acc1 = _conv_rows(x_ref, w1_ref, H, M, wcin)
    h1 = jnp.maximum(acc1 + sh1_ref[...], 0.0)

    # ---- intermediate activation: bf16, only 2 full-lane halo rows zeroed ----
    zrow = jnp.zeros((nb, 1, wcmid), mid_ref.dtype)
    mid_ref[:, 0:1, :] = zrow
    mid_ref[:, H + 1:H + 2, :] = zrow
    mid_ref[:, 1:H + 1, :] = h1.reshape(nb, H, wcmid).astype(mid_ref.dtype)

    # ---- conv2 ----
    acc2 = _conv_rows(mid_ref, w2_ref, H, M, wcmid)
    h2 = jnp.maximum(acc2 + sh2_ref[...], 0.0)
    o_ref[...] = h2.reshape(nb, H, wcout).astype(o_ref.dtype)


def _banded_weights(w_hwio_scaled, W):
    """Fold the 3 x-axis taps (and their zero padding) of a 3x3 conv into one
    banded matrix per kernel row dy, mapping a lane-merged input row (W*Cin) to
    a lane-merged output row (W*Cout)."""
    _, _, ci, co = w_hwio_scaled.shape
    kx = jnp.arange(3)[:, None, None]            # (3,1,1)
    w_in = jnp.arange(W)[None, :, None]          # (1,W,1) input pixel w'
    w_out = jnp.arange(W)[None, None, :]         # (1,1,W) output pixel w
    # sel[kx, w', w] = 1  iff  w' == w + kx - 1  (out-of-range => zero padding)
    sel = (w_in == w_out + kx - 1).astype(w_hwio_scaled.dtype)       # (3, W, W)
    banded = jnp.einsum('xuw,yxio->yuiwo', sel, w_hwio_scaled)       # (3,W,ci,W,co)
    return banded.reshape(3, W * ci, W * co)


def _pick_batch_block(N, per_image_bytes, budget_bytes):
    """Largest batch block whose double-buffered working set fits the VMEM
    budget while keeping at least min(4, N) grid steps (pipelining / megacore)."""
    nb = 1
    min_steps = min(4, N)
    for cand in range(1, N + 1):
        if N % cand:
            continue
        if N // cand < min_steps:
            break
        if 2 * cand * per_image_bytes <= budget_bytes:
            nb = cand
    return nb


def inconv_forward(x_nchw, w1_hwio, s1, t1, w2_hwio, s2, t2, *,
                   batch_block=None, compute_dtype=jnp.bfloat16,
                   out_dtype=jnp.float32, vmem_budget_bytes=16 * 1024 * 1024):
    """x_nchw: (N, Cin, H, W) float32. Returns (N, Cout, H, W) float32.

    s*/t* are the folded (eval-mode BN + conv bias) per-channel scale / shift.
    NCHW <-> lane-merged glue is kept here only to match the PyTorch interface;
    in a full UNet pipeline keep the (N, H, W*C) layout end-to-end.
    """
    N, Cin, H, W = x_nchw.shape
    Cmid = w1_hwio.shape[-1]
    Cout = w2_hwio.shape[-1]

    # --- activations: NCHW -> lane-merged (N, H+2, W*Cin), bf16, dy halo rows ---
    x_nhwc = jnp.transpose(x_nchw, (0, 2, 3, 1))
    x_pad = jnp.pad(x_nhwc, ((0, 0), (1, 1), (0, 0), (0, 0)))
    x_lm = x_pad.reshape(N, H + 2, W * Cin).astype(compute_dtype)

    # --- weights: BN scale folded in, banded per-dy matrices, bf16 operands ---
    w1b = _banded_weights(w1_hwio * s1, W).astype(compute_dtype)   # (3, W*Cin,  W*Cmid)
    w2b = _banded_weights(w2_hwio * s2, W).astype(compute_dtype)   # (3, W*Cmid, W*Cout)
    sh1 = jnp.tile(t1.astype(jnp.float32), W).reshape(1, W * Cmid)
    sh2 = jnp.tile(t2.astype(jnp.float32), W).reshape(1, W * Cout)

    # --- VMEM-budget-driven batch blocking ---
    def pad_lane(v):
        return ((v + 127) // 128) * 128
    out_isize = jnp.dtype(out_dtype).itemsize
    per_image = ((H + 2) * pad_lane(W * Cin) * 2          # input block (bf16)
                 + (H + 2) * pad_lane(W * Cmid) * 2       # mid scratch (bf16)
                 + H * pad_lane(W * Cout) * out_isize)    # output block
    if batch_block is None:
        batch_block = _pick_batch_block(N, per_image, vmem_budget_bytes)
    assert N % batch_block == 0, "batch must be divisible by batch_block"
    nb = batch_block
    grid = (N // nb,)

    weight_bytes = w1b.size * 2 + w2b.size * 2 + (sh1.size + sh2.size) * 4
    vmem_limit = int(min(64 * 2 ** 20,
                         max(32 * 2 ** 20,
                             4 * (weight_bytes + 2 * nb * per_image))))

    out = pl.pallas_call(
        _double_conv_kernel,
        out_shape=jax.ShapeDtypeStruct((N, H, W * Cout), out_dtype),
        grid_spec=pltpu.PrefetchScalarGridSpec(
            num_scalar_prefetch=0,
            grid=grid,
            in_specs=[
                # NOTE: with large VMEM headroom (v6e) this input spec could use
                # pipeline_mode=pl.Buffered(3) for a deeper prefetch pipeline.
                pl.BlockSpec((nb, H + 2, W * Cin), lambda n: (n, 0, 0)),
                pl.BlockSpec((3, W * Cin, W * Cmid), lambda n: (0, 0, 0)),
                pl.BlockSpec((1, W * Cmid), lambda n: (0, 0)),
                pl.BlockSpec((3, W * Cmid, W * Cout), lambda n: (0, 0, 0)),
                pl.BlockSpec((1, W * Cout), lambda n: (0, 0)),
            ],
            out_specs=pl.BlockSpec((nb, H, W * Cout), lambda n: (n, 0, 0)),
            scratch_shapes=[pltpu.VMEM((nb, H + 2, W * Cmid), compute_dtype)],
        ),
        compiler_params=pltpu.CompilerParams(
            dimension_semantics=("parallel",),
            vmem_limit_bytes=vmem_limit),
    )(x_lm, w1b, sh1, w2b, sh2)

    # (N, H, W*Cout) -> NCHW to match the PyTorch output layout (glue only)
    out = out.reshape(N, H, W, Cout)
    return jnp.transpose(out, (0, 3, 1, 2)).astype(jnp.float32)


def _fold_bn(conv_bias, gamma, beta, mean, var):
    """Fold conv bias + eval-mode BatchNorm into per-channel scale/shift."""
    scale = gamma / jnp.sqrt(var + EPS)
    shift = beta + scale * (conv_bias - mean)
    return scale, shift


def _ref_forward(x_nchw, w1_oihw, cb1, g1, be1, m1, v1,
                 w2_oihw, cb2, g2, be2, m2, v2):
    def conv_bn_relu(x, w, cb, g, be, m, v):
        y = jax.lax.conv_general_dilated(
            x, w, window_strides=(1, 1), padding="SAME",
            dimension_numbers=("NCHW", "OIHW", "NCHW"))
        y = y + cb[None, :, None, None]
        y = (y - m[None, :, None, None]) / jnp.sqrt(v[None, :, None, None] + EPS)
        y = y * g[None, :, None, None] + be[None, :, None, None]
        return jnp.maximum(y, 0.0)

    x = conv_bn_relu(x_nchw, w1_oihw, cb1, g1, be1, m1, v1)
    x = conv_bn_relu(x, w2_oihw, cb2, g2, be2, m2, v2)
    return x


if __name__ == "__main__":
    N, Cin, Cmid_out, H, W = 2, 4, 8, 16, 16  # inconv(in_ch=4, out_ch=8)
    key = jax.random.PRNGKey(0)
    ks = jax.random.split(key, 16)

    x = jax.random.normal(ks[0], (N, Cin, H, W), jnp.float32)

    # conv1 params (PyTorch OIHW layout) + BN1 params
    w1_oihw = 0.1 * jax.random.normal(ks[1], (Cmid_out, Cin, 3, 3), jnp.float32)
    cb1 = 0.1 * jax.random.normal(ks[2], (Cmid_out,), jnp.float32)
    g1 = 1.0 + 0.1 * jax.random.normal(ks[3], (Cmid_out,), jnp.float32)
    be1 = 0.1 * jax.random.normal(ks[4], (Cmid_out,), jnp.float32)
    m1 = 0.1 * jax.random.normal(ks[5], (Cmid_out,), jnp.float32)
    v1 = jax.random.uniform(ks[6], (Cmid_out,), jnp.float32, 0.5, 1.5)

    # conv2 params + BN2 params
    w2_oihw = 0.1 * jax.random.normal(ks[7], (Cmid_out, Cmid_out, 3, 3), jnp.float32)
    cb2 = 0.1 * jax.random.normal(ks[8], (Cmid_out,), jnp.float32)
    g2 = 1.0 + 0.1 * jax.random.normal(ks[9], (Cmid_out,), jnp.float32)
    be2 = 0.1 * jax.random.normal(ks[10], (Cmid_out,), jnp.float32)
    m2 = 0.1 * jax.random.normal(ks[11], (Cmid_out,), jnp.float32)
    v2 = jax.random.uniform(ks[12], (Cmid_out,), jnp.float32, 0.5, 1.5)

    # Fold conv bias + BN (eval mode) into per-channel scale/shift
    s1, t1 = _fold_bn(cb1, g1, be1, m1, v1)
    s2, t2 = _fold_bn(cb2, g2, be2, m2, v2)

    # OIHW -> HWIO for the lane-merged kernel weights
    w1_hwio = jnp.transpose(w1_oihw, (2, 3, 1, 0))
    w2_hwio = jnp.transpose(w2_oihw, (2, 3, 1, 0))

    out = inconv_forward(x, w1_hwio, s1, t1, w2_hwio, s2, t2)
    out = jax.block_until_ready(out)

    ref = _ref_forward(x, w1_oihw, cb1, g1, be1, m1, v1,
                       w2_oihw, cb2, g2, be2, m2, v2)
    # bf16 matmul operands / bf16 mid (f32 accumulation) -> loosened tolerance
    np.testing.assert_allclose(np.asarray(out), np.asarray(ref),
                               rtol=5e-2, atol=5e-2)
    print("KERNEL_OK")
</pallas_src>

<mosaic_0001>
module attributes {stable_mosaic.version = 11 : i64} {
  func.func @_double_conv_kernel(%arg0: i32, %arg1: memref<1x18x64xbf16, #tpu.memory_space<vmem>>, %arg2: memref<3x64x128xbf16, #tpu.memory_space<vmem>>, %arg3: memref<1x128xf32, #tpu.memory_space<vmem>>, %arg4: memref<3x128x128xbf16, #tpu.memory_space<vmem>>, %arg5: memref<1x128xf32, #tpu.memory_space<vmem>>, %arg6: memref<1x16x128xf32, #tpu.memory_space<vmem>>, %arg7: memref<1x18x128xbf16, #tpu.memory_space<vmem>>) attributes {dimension_semantics = [#tpu.dimension_semantics<parallel>], iteration_bounds = array<i64: 2>, scalar_prefetch = 0 : i64, scratch_operands = 1 : i64, tpu.core_type = #tpu.core_type<tc>, window_params = [{transform_indices = @transform_0, window_bounds = array<i64: 1, 18, 64>}, {pipeline_mode = #tpu.pipeline_mode<synchronous>, transform_indices = @transform_1, window_bounds = array<i64: 3, 64, 128>}, {pipeline_mode = #tpu.pipeline_mode<synchronous>, transform_indices = @transform_2, window_bounds = array<i64: 1, 128>}, {pipeline_mode = #tpu.pipeline_mode<synchronous>, transform_indices = @transform_3, window_bounds = array<i64: 3, 128, 128>}, {pipeline_mode = #tpu.pipeline_mode<synchronous>, transform_indices = @transform_4, window_bounds = array<i64: 1, 128>}, {transform_indices = @transform_5, window_bounds = array<i64: 1, 16, 128>}]} {
    %c0 = arith.constant 0 : index
    %c0_0 = arith.constant 0 : index
    %c0_1 = arith.constant 0 : index
    %0 = vector.load %arg1[%c0, %c0_0, %c0_1] : memref<1x18x64xbf16, #tpu.memory_space<vmem>>, vector<1x16x64xbf16>
    %1 = vector.shape_cast %0 : vector<1x16x64xbf16> to vector<16x64xbf16>
    %c0_2 = arith.constant 0 : index
    %c0_3 = arith.constant 0 : index
    %c0_4 = arith.constant 0 : index
    %2 = vector.load %arg2[%c0_2, %c0_3, %c0_4] : memref<3x64x128xbf16, #tpu.memory_space<vmem>>, vector<1x64x128xbf16>
    %3 = vector.shape_cast %2 : vector<1x64x128xbf16> to vector<64x128xbf16>
    %cst = arith.constant dense<0.000000e+00> : vector<16x128xf32>
    %4 = tpu.matmul %1, %3, %cst {dimension_numbers = #tpu.dot_dimension_numbers<[1], [0], [0], [1], [0, 0, 1, 1], [], []>} : vector<16x64xbf16>, vector<64x128xbf16>, vector<16x128xf32> -> vector<16x128xf32>
    %c0_5 = arith.constant 0 : index
    %c1 = arith.constant 1 : index
    %c0_6 = arith.constant 0 : index
    %5 = vector.load %arg1[%c0_5, %c1, %c0_6] : memref<1x18x64xbf16, #tpu.memory_space<vmem>>, vector<1x16x64xbf16>
    %6 = vector.shape_cast %5 : vector<1x16x64xbf16> to vector<16x64xbf16>
    %c1_7 = arith.constant 1 : index
    %c0_8 = arith.constant 0 : index
    %c0_9 = arith.constant 0 : index
    %7 = vector.load %arg2[%c1_7, %c0_8, %c0_9] : memref<3x64x128xbf16, #tpu.memory_space<vmem>>, vector<1x64x128xbf16>
    %8 = vector.shape_cast %7 : vector<1x64x128xbf16> to vector<64x128xbf16>
    %cst_10 = arith.constant dense<0.000000e+00> : vector<16x128xf32>
    %9 = tpu.matmul %6, %8, %cst_10 {dimension_numbers = #tpu.dot_dimension_numbers<[1], [0], [0], [1], [0, 0, 1, 1], [], []>} : vector<16x64xbf16>, vector<64x128xbf16>, vector<16x128xf32> -> vector<16x128xf32>
    %10 = arith.addf %4, %9 : vector<16x128xf32>
    %c0_11 = arith.constant 0 : index
    %c2 = arith.constant 2 : index
    %c0_12 = arith.constant 0 : index
    %11 = vector.load %arg1[%c0_11, %c2, %c0_12] : memref<1x18x64xbf16, #tpu.memory_space<vmem>>, vector<1x16x64xbf16>
    %12 = vector.shape_cast %11 : vector<1x16x64xbf16> to vector<16x64xbf16>
    %c2_13 = arith.constant 2 : index
    %c0_14 = arith.constant 0 : index
    %c0_15 = arith.constant 0 : index
    %13 = vector.load %arg2[%c2_13, %c0_14, %c0_15] : memref<3x64x128xbf16, #tpu.memory_space<vmem>>, vector<1x64x128xbf16>
    %14 = vector.shape_cast %13 : vector<1x64x128xbf16> to vector<64x128xbf16>
    %cst_16 = arith.constant dense<0.000000e+00> : vector<16x128xf32>
    %15 = tpu.matmul %12, %14, %cst_16 {dimension_numbers = #tpu.dot_dimension_numbers<[1], [0], [0], [1], [0, 0, 1, 1], [], []>} : vector<16x64xbf16>, vector<64x128xbf16>, vector<16x128xf32> -> vector<16x128xf32>
    %16 = arith.addf %10, %15 : vector<16x128xf32>
    %c0_17 = arith.constant 0 : index
    %c0_18 = arith.constant 0 : index
    %17 = vector.load %arg3[%c0_17, %c0_18] : memref<1x128xf32, #tpu.memory_space<vmem>>, vector<1x128xf32>
    %18 = vector.broadcast %17 : vector<1x128xf32> to vector<16x128xf32>
    %19 = arith.addf %16, %18 : vector<16x128xf32>
    %cst_19 = arith.constant 0.000000e+00 : f32
    %20 = vector.broadcast %cst_19 : f32 to vector<16x128xf32>
    %21 = arith.maximumf %19, %20 : vector<16x128xf32>
    %cst_20 = arith.constant 0.000000e+00 : bf16
    %22 = vector.broadcast %cst_20 : bf16 to vector<1x1x128xbf16>
    %c0_21 = arith.constant 0 : index
    %c0_22 = arith.constant 0 : index
    %c0_23 = arith.constant 0 : index
    %23 = vector.load %arg7[%c0_21, %c0_22, %c0_23] : memref<1x18x128xbf16, #tpu.memory_space<vmem>>, vector<1x1x128xbf16>
    tpu.vector_store %arg7[%c0_21, %c0_22, %c0_23], %22 {strides = array<i32>} : memref<1x18x128xbf16, #tpu.memory_space<vmem>>, vector<1x1x128xbf16>,
    %c0_24 = arith.constant 0 : index
    %c17 = arith.constant 17 : index
    %c0_25 = arith.constant 0 : index
    %24 = vector.load %arg7[%c0_24, %c17, %c0_25] : memref<1x18x128xbf16, #tpu.memory_space<vmem>>, vector<1x1x128xbf16>
    tpu.vector_store %arg7[%c0_24, %c17, %c0_25], %22 {strides = array<i32>} : memref<1x18x128xbf16, #tpu.memory_space<vmem>>, vector<1x1x128xbf16>,
    %25 = vector.shape_cast %21 : vector<16x128xf32> to vector<1x16x128xf32>
    %26 = arith.truncf %25 : vector<1x16x128xf32> to vector<1x16x128xbf16>
    %c0_26 = arith.constant 0 : index
    %c1_27 = arith.constant 1 : index
    %c0_28 = arith.constant 0 : index
    %27 = vector.load %arg7[%c0_26, %c1_27, %c0_28] : memref<1x18x128xbf16, #tpu.memory_space<vmem>>, vector<1x16x128xbf16>
    tpu.vector_store %arg7[%c0_26, %c1_27, %c0_28], %26 {strides = array<i32>} : memref<1x18x128xbf16, #tpu.memory_space<vmem>>, vector<1x16x128xbf16>,
    %c0_29 = arith.constant 0 : index
    %c0_30 = arith.constant 0 : index
    %c0_31 = arith.constant 0 : index
    %28 = vector.load %arg7[%c0_29, %c0_30, %c0_31] : memref<1x18x128xbf16, #tpu.memory_space<vmem>>, vector<1x16x128xbf16>
    %29 = vector.shape_cast %28 : vector<1x16x128xbf16> to vector<16x128xbf16>
    %c0_32 = arith.constant 0 : index
    %c0_33 = arith.constant 0 : index
    %c0_34 = arith.constant 0 : index
    %30 = vector.load %arg4[%c0_32, %c0_33, %c0_34] : memref<3x128x128xbf16, #tpu.memory_space<vmem>>, vector<1x128x128xbf16>
    %31 = vector.shape_cast %30 : vector<1x128x128xbf16> to vector<128x128xbf16>
    %cst_35 = arith.constant dense<0.000000e+00> : vector<16x128xf32>
    %32 = tpu.matmul %29, %31, %cst_35 {dimension_numbers = #tpu.dot_dimension_numbers<[1], [0], [0], [1], [0, 0, 1, 1], [], []>} : vector<16x128xbf16>, vector<128x128xbf16>, vector<16x128xf32> -> vector<16x128xf32>
    %c0_36 = arith.constant 0 : index
    %c1_37 = arith.constant 1 : index
    %c0_38 = arith.constant 0 : index
    %33 = vector.load %arg7[%c0_36, %c1_37, %c0_38] : memref<1x18x128xbf16, #tpu.memory_space<vmem>>, vector<1x16x128xbf16>
    %34 = vector.shape_cast %33 : vector<1x16x128xbf16> to vector<16x128xbf16>
    %c1_39 = arith.constant 1 : index
    %c0_40 = arith.constant 0 : index
    %c0_41 = arith.constant 0 : index
    %35 = vector.load %arg4[%c1_39, %c0_40, %c0_41] : memref<3x128x128xbf16, #tpu.memory_space<vmem>>, vector<1x128x128xbf16>
    %36 = vector.shape_cast %35 : vector<1x128x128xbf16> to vector<128x128xbf16>
    %cst_42 = arith.constant dense<0.000000e+00> : vector<16x128xf32>
    %37 = tpu.matmul %34, %36, %cst_42 {dimension_numbers = #tpu.dot_dimension_numbers<[1], [0], [0], [1], [0, 0, 1, 1], [], []>} : vector<16x128xbf16>, vector<128x128xbf16>, vector<16x128xf32> -> vector<16x128xf32>
    %38 = arith.addf %32, %37 : vector<16x128xf32>
    %c0_43 = arith.constant 0 : index
    %c2_44 = arith.constant 2 : index
    %c0_45 = arith.constant 0 : index
    %39 = vector.load %arg7[%c0_43, %c2_44, %c0_45] : memref<1x18x128xbf16, #tpu.memory_space<vmem>>, vector<1x16x128xbf16>
    %40 = vector.shape_cast %39 : vector<1x16x128xbf16> to vector<16x128xbf16>
    %c2_46 = arith.constant 2 : index
    %c0_47 = arith.constant 0 : index
    %c0_48 = arith.constant 0 : index
    %41 = vector.load %arg4[%c2_46, %c0_47, %c0_48] : memref<3x128x128xbf16, #tpu.memory_space<vmem>>, vector<1x128x128xbf16>
    %42 = vector.shape_cast %41 : vector<1x128x128xbf16> to vector<128x128xbf16>
    %cst_49 = arith.constant dense<0.000000e+00> : vector<16x128xf32>
    %43 = tpu.matmul %40, %42, %cst_49 {dimension_numbers = #tpu.dot_dimension_numbers<[1], [0], [0], [1], [0, 0, 1, 1], [], []>} : vector<16x128xbf16>, vector<128x128xbf16>, vector<16x128xf32> -> vector<16x128xf32>
    %44 = arith.addf %38, %43 : vector<16x128xf32>
    %c0_50 = arith.constant 0 : index
    %c0_51 = arith.constant 0 : index
    %45 = vector.load %arg5[%c0_50, %c0_51] : memref<1x128xf32, #tpu.memory_space<vmem>>, vector<1x128xf32>
    %46 = vector.broadcast %45 : vector<1x128xf32> to vector<16x128xf32>
    %47 = arith.addf %44, %46 : vector<16x128xf32>
    %cst_52 = arith.constant 0.000000e+00 : f32
    %48 = vector.broadcast %cst_52 : f32 to vector<16x128xf32>
    %49 = arith.maximumf %47, %48 : vector<16x128xf32>
    %50 = vector.shape_cast %49 : vector<16x128xf32> to vector<1x16x128xf32>
    %c0_53 = arith.constant 0 : index
    %c0_54 = arith.constant 0 : index
    %c0_55 = arith.constant 0 : index
    %51 = vector.load %arg6[%c0_53, %c0_54, %c0_55] : memref<1x16x128xf32, #tpu.memory_space<vmem>>, vector<1x16x128xf32>
    tpu.vector_store %arg6[%c0_53, %c0_54, %c0_55], %50 {strides = array<i32>} : memref<1x16x128xf32, #tpu.memory_space<vmem>>, vector<1x16x128xf32>,
    return
  }
  func.func @transform_0(%arg0: i32) -> (i32, i32, i32) {
    %c0_i32 = arith.constant 0 : i32
    %c0_i32_0 = arith.constant 0 : i32
    %c0_i32_1 = arith.constant 0 : i32
    return %arg0, %c0_i32, %c0_i32_0 : i32, i32, i32
  }
  func.func @transform_1(%arg0: i32) -> (i32, i32, i32) {
    %c0_i32 = arith.constant 0 : i32
    %c0_i32_0 = arith.constant 0 : i32
    %c0_i32_1 = arith.constant 0 : i32
    %c0_i32_2 = arith.constant 0 : i32
    return %c0_i32, %c0_i32_0, %c0_i32_1 : i32, i32, i32
  }
  func.func @transform_2(%arg0: i32) -> (i32, i32) {
    %c0_i32 = arith.constant 0 : i32
    %c0_i32_0 = arith.constant 0 : i32
    %c0_i32_1 = arith.constant 0 : i32
    return %c0_i32, %c0_i32_0 : i32, i32
  }
  func.func @transform_3(%arg0: i32) -> (i32, i32, i32) {
    %c0_i32 = arith.constant 0 : i32
    %c0_i32_0 = arith.constant 0 : i32
    %c0_i32_1 = arith.constant 0 : i32
    %c0_i32_2 = arith.constant 0 : i32
    return %c0_i32, %c0_i32_0, %c0_i32_1 : i32, i32, i32
  }
  func.func @transform_4(%arg0: i32) -> (i32, i32) {
    %c0_i32 = arith.constant 0 : i32
    %c0_i32_0 = arith.constant 0 : i32
    %c0_i32_1 = arith.constant 0 : i32
    return %c0_i32, %c0_i32_0 : i32, i32
  }
  func.func @transform_5(%arg0: i32) -> (i32, i32, i32) {
    %c0_i32 = arith.constant 0 : i32
    %c0_i32_0 = arith.constant 0 : i32
    %c0_i32_1 = arith.constant 0 : i32
    return %arg0, %c0_i32, %c0_i32_0 : i32, i32, i32
  }
}

</mosaic_0001>

<bundles_post_ra>
// kernel: tpu_custom_call.1
= control target key start
LH: loop header
LB: loop body
LE: loop exit
PB: predicated region body
PF: predicated region fallthrough
CT: control target
= control target key end

     0   :  { %10 = vsyncpa [#allocation4], 0  ;;  %s1769_s0 = inlined_call_operand.vmem [shape: bf16[2,18,64], index: 0, kind: input, shape index: {}]   ;;  %s1770_s1 = inlined_call_operand.hbm [shape: bf16[3,64,128], index: 1, kind: input, shape index: {}]   ;;  %s1771_s2 = inlined_call_operand.vmem [shape: f32[1,128], index: 2, kind: input, shape index: {}]   ;;  %s1772_s3 = inlined_call_operand.hbm [shape: bf16[3,128,128], index: 3, kind: input, shape index: {}]   ;;  %s1773_s4 = inlined_call_operand.vmem [shape: f32[1,128], index: 4, kind: input, shape index: {}]   ;;  %s1774_s5 = inlined_call_operand.hbm [shape: f32[2,16,128], index: 5, kind: output, shape index: {}]  }
   0x1   :  { %11 = vsyncpa [#allocation7], 0 }
   0x2   :  { %12 = vsyncpa [#allocation5], 0 }
   0x3   :  { %14 = vsyncpa [#allocation5 + $0x1], 0  ;;  %s1521_s18 = smov 0   ;;  %s1523_s19 = smov 0  }
   0x4   :  { %s1525_s20 = smov 0   ;;  %s1527_s21 = smov 0  }
   0x5 LB: > { %s1542_s22 = sadd.s32 4294967295, %s1480_s21   ;;  %s1040_s23 = sadd.s32 4294967294, %s1480_s21   ;;  %s1480_s21 = sphi %s1527_s21, %s1794_s21   ;;  %s1476_s20 = sphi %s1525_s20, %s1793_s20   ;;  %s1472_s19 = sphi %s1523_s19, %s1792_s19   ;;  %s1468_s18 = sphi %s1521_s18, %s1791_s18  }
   0x6   : > { %s1546_s24 = sadd.s32 1, %s1480_s21   ;;  %s137_s25 = sadd.s32 1, %s1476_s20 }
   0x7   : > { %s134_s26 = ssub.s32 %s1480_s21, %s1546_s24  ;;  %p147_p0 = scmp.ne.s32.totalorder %s1476_s20, %s1472_s19 }
   0x8   : > { %p135_p1 = scmp.eq.s32.totalorder %s134_s26, 0  ;;  %p148_p2 = scmp.eq.s32.totalorder %s1542_s22, 1 }
   0x9   : > { %p153_p3 = scmp.ne.s32.totalorder %s1472_s19, %s1468_s18  ;;  %p154_p4 = scmp.eq.s32.totalorder %s1040_s23, 1 }
   0xa   : > { %s1557_s27 = scalar_select %p135_p1, %s1476_s20, %s137_s25  }
   0xb   : > { %p1559_p5 = por %p148_p2, %p147_p0  ;;  %p1563_p6 = por %p154_p4, %p153_p3 }
   0xc   : > { %p1041_p7 = scmp.ge.s32.totalorder %s1480_s21, 1  ;;  %p161_p8 = scmp.lt.s32.totalorder %s1480_s21, 3 }
   0xd   : > { %s1778_s28 = scalar_select %p1559_p5, 1, 0 }
   0xe   : > { %s1779_s29 = scalar_select %p1563_p6, 1, 0 }
   0xf   : > { %p1775_p9 = scmp.eq.s32.totalorder %s1542_s22, 0  ;;  %p1570_p10 = pnand %p1041_p7, %p161_p8 }
  0x10   : > { %s1482_s6 = smov [#allocation3]   ;;  %s1483_s9 = smov [#allocation6]  }
  0x11   : > { %s1780_s30 = scalar_select %p1570_p10, 1, 0 }
  0x12   : > { %s173_s7 = sshll.u32 %s1482_s6, 4  ;;  %p1256_p11 = pneg %p1570_p10  ;;  %s174_s7 = int_to_ptr.vmem [resolvable:$true] %s173_s7 }
  0x13   : > { %s189_s10 = sshll.u32 %s1483_s9, 4  ;;  %s1354_s13 = scalar_lea.hbm %s1770_s1, 1536  ;;  %s1582_s10 = int_to_ptr.vmem [resolvable:$true] %s189_s10 }
  0x14   : > { %p1578_p12 = pnand %p1775_p9, %p1256_p11  ;;  %p1355_p13 = scmp.ne.s32.totalorder %s1770_s1, %s1354_s13 }
  0x15   : > { %p1361_p3 = scmp.lt.u32.totalorder %s1354_s13, %s1770_s1 }
  0x16   : > { %p1356_p0 = pneg %p1578_p12 }
  0x18   : > { %p1357_p1 = pnand %p1356_p0, %p1355_p13 }
  0x1a   : > { %p1358_p2 = pneg %p1357_p1 }
  0x1c   : > { %p1363_p4 = pnand %p1361_p3, %p1358_p2 }
  0x1e   : > { %1366 = shalt.err (!%p1363_p4)
}
  0x1f   : > { %s1367_s23 = scalar_lea.vmem %s174_s7, 1536  ;;  %p1375_p9 = scmp.lt.s32.totalorder %s174_s7, %s174_s7 }
  0x20   : > { %p1368_p7 = scmp.ne.s32.totalorder %s174_s7, %s1367_s23  ;;  %p1376_p6 = scmp.lt.s32.totalorder %s1367_s23, %s1367_s23 }
  0x22   : > { %p1370_p8 = pnand %p1368_p7, %p1356_p0  ;;  %p1377_p5 = por %p1376_p6, %p1375_p9 }
  0x24   : > { %p1371_p11 = pneg %p1370_p8 }
  0x26   : > { %p1378_p10 = pnand %p1377_p5, %p1371_p11 }
  0x28   : > { %1381 = shalt.err (!%p1378_p10)
}
  0x29   : > { %s1484_s25 = smov 64   ;;  %s1485_s26 = smov 4  }
  0x2a   : > { %1259 = dma.hbm_to_vmem [thread:$0]  (!%p1578_p12), %s1770_s1, 1536, %s174_s7, [#allocation4], %s1484_s25, %s1484_s25, %s1485_s26  }
  0x2b   : > { %s1382_s13 = scalar_lea.hbm %s1772_s3, 3072 }
  0x2c   : > { %p1383_p13 = scmp.ne.s32.totalorder %s1772_s3, %s1382_s13  ;;  %p1389_p9 = scmp.lt.u32.totalorder %s1382_s13, %s1772_s3 }
  0x2e   : > { %p1385_p5 = pnand %p1383_p13, %p1356_p0 }
  0x30   : > { %p1386_p6 = pneg %p1385_p5 }
  0x32   : > { %p1391_p10 = pnand %p1389_p9, %p1386_p6 }
  0x34   : > { %1394 = shalt.err (!%p1391_p10)
}
  0x35   : > { %s1395_s7 = scalar_lea.vmem %s1582_s10, 3072  ;;  %p1403_p4 = scmp.lt.s32.totalorder %s1582_s10, %s1582_s10 }
  0x36   : > { %p1396_p1 = scmp.ne.s32.totalorder %s1582_s10, %s1395_s7  ;;  %p1404_p7 = scmp.lt.s32.totalorder %s1395_s7, %s1395_s7 }
  0x38   : > { %p1398_p2 = pnand %p1396_p1, %p1356_p0  ;;  %p1405_p8 = por %p1404_p7, %p1403_p4 }
  0x3a   : > { %p1399_p3 = pneg %p1398_p2 }
  0x3c   : > { %p1406_p11 = pnand %p1405_p8, %p1399_p3 }
  0x3e   : > { %1409 = shalt.err (!%p1406_p11)
}
  0x3f   : > { %1262 = dma.hbm_to_vmem [thread:$0]  (!%p1578_p12), %s1772_s3, 3072, %s1582_s10, [#allocation7], %s1484_s25, %s1484_s25, %s1485_s26  }
  0x40   : > { %p1782_p13 = scmp.ne.s32.totalorder %s1780_s30, 0 }
  0x41   : > { %p1783_p5 = scmp.eq.s32.totalorder (!%p1782_p13), %s1542_s22, 0 }
  0x42   : > { %216 = sbr.rel (%p1782_p13) target bundleno = 625 (0x271), region = 40 }
  0x49   : > { %1455 = dma.done.wait (%p1783_p5), [#allocation4], 1536   ;;  %p1784_p0 = pmov %p1783_p5 }
  0x4b   : > { %1457 = vsyncadd (%p1784_p0), [#allocation4], 4294965760  ;;  %p1785_p6 = pmov %p1784_p0 }
  0x4c   : > { %p1786_p9 = pmov %p1784_p0 }
  0x4d   : > { %1459 = dma.done.wait (%p1785_p6), [#allocation7], 3072  }
  0x4e   : > { %1461 = vsyncadd (%p1786_p9), [#allocation7], 4294964224  ;;  %p248_p10 = scmp.lt.s32.totalorder %s1542_s22, 1  ;;  %v1486_v0 = vmov 0.0   ;;  %vm1487_vm0 = vmmov 0   ;;  %v1312_v1 = vld [vmem:[#allocation3 + $0x20] sm:$0xff]  }
  0x4f   : > { %1149 = vmatprep.subr.bf16.mxu0 %v1486_v0  ;;  %1161 = vmatprep.subr.bf16.mxu1 %v1486_v0  ;;  %v1313_v2 = vld [vmem:[#allocation3] sm:$0xff]   ;;  %v1314_v3 = vld [vmem:[#allocation3 + $0x28] sm:$0xff]   ;;  %v1316_v5 = vld [vmem:[#allocation3 + $0x30] sm:$0xff]   ;;  %vm282_vm1 = vsmask.f32 7424  ;;  %vm319_vm2 = vcmask 523264  }
  0x50   : > { %1157 = vmatprep.mubr.msk.bf16.mxu0 %vm1487_vm0, %v1486_v0  ;;  %1169 = vmatprep.mubr.msk.bf16.mxu1 %vm1487_vm0, %v1486_v0  ;;  %s249_s30 = scalar_select %p248_p10, %s1542_s22, 1  ;;  %v1315_v4 = vld [vmem:[#allocation3 + $0x8] sm:$0xff]   ;;  %v1317_v6 = vld [vmem:[#allocation3 + $0x10] sm:$0xff]   ;;  %v1318_v9 = vld [vmem:[#allocation3 + $0x38] sm:$0xff]   ;;  %vm444_vm3 = vcmask 1046528   ;;  %vm529_vm4 = vcmask 1040384  }
  0x51   : > { %1150 = vmatpush3.bf16.msra.mxu0 %v1312_v1  ;;  %1162 = vmatpush3.bf16.msra.mxu1 %v1313_v2  ;;  %v1319_v12 = vld [vmem:[#allocation3 + $0x18] sm:$0xff]   ;;  %v1322_v18 = vld [vmem:[#allocation3 + $0x40] sm:$0xff]   ;;  %v1323_v23 = vld [vmem:[#allocation3 + $0x48] sm:$0xff]   ;;  %vm530_vm5 = vsmask.f32 256  ;;  %vm568_vm9 = vcmask 1043456  }
  0x52   : > { %s1245_s8 = smul.u32 12, %s249_s30  ;;  %1151 = vmatprep.subr.bf16.mxu0 %v1486_v0  ;;  %1163 = vmatprep.subr.bf16.mxu1 %v1486_v0  ;;  %v1324_v26 = vld [vmem:[#allocation3 + $0x50] sm:$0xff]   ;;  %v1325_v27 = vld [vmem:[#allocation3 + $0x58] sm:$0xff]   ;;  %v1327_v29 = vld [vmem:[#allocation6] sm:$0xff]   ;;  %vm535_vm7 = vsmask.f32 7938 }
  0x53   : > { %v1328_v30 = vld [vmem:[#allocation6 + $0x8] sm:$0xff]   ;;  %v1329_v31 = vld [vmem:[#allocation6 + $0x40] sm:$0xff]   ;;  %v1330_v32 = vld [vmem:[#allocation6 + $0x10] sm:$0xff]   ;;  %vm546_vm10 = vsmask.f32 4368  ;;  %s245_s12 = sand.u32 1, %s1472_s19  }
  0x54   : > { %s252_s26 = scalar_lea.vmem %s1769_s0, %s1245_s8  ;;  %vm1679_vm6 = vmand %vm529_vm4, %vm530_vm5  ;;  %v532_v34 = vld [vmem:[#allocation2] sm:$0x1]  ;;  %v537_v35 = vld [vmem:[#allocation2 + $0x8] sm:$0x1]  ;;  %s1048_s13 = sshll.u32 %s245_s12, 4 }
  0x55   : > { %1152 = vmatpush3.bf16.msra.mxu0 %v1314_v3  ;;  %1164 = vmatpush3.bf16.msra.mxu1 %v1315_v4  ;;  %v254_v7 = vld [vmem:[%s252_s26] sm:$0xf]  ;;  %v255_v8 = vld [vmem:[%s252_s26 + $0x4] sm:$0xf]  ;;  %v533_v36 = vsel %vm1679_vm6, 0, %v532_v34  ;;  %vm536_vm8 = vmand %vm529_vm4, %vm535_vm7  ;;  %s247_s16 = scalar_lea.vmem [#allocation8], %s1048_s13 }
  0x56   : > { %1153 = vmatprep.subr.bf16.mxu0 %v1486_v0  ;;  %1165 = vmatprep.subr.bf16.mxu1 %v1486_v0  ;;  %v1050_v10 = vcombine.low %v254_v7, %v255_v8  ;;  %v1321_v11 = vld [vmem:[%s252_s26 + $0x8] ss:$0 sps:$4 sm:$0x11]   ;;  %v431_v19 = vld [vmem:[%s252_s26] sm:$0xe]  ;;  %v1331_v37 = vld [vmem:[#allocation6 + $0x48] sm:$0xff]  }
  0x57   : > { %v291_v15 = vshll.u32 %v1321_v11, 16  ;;  %v1062_v21 = vcombine.low %v431_v19, %v255_v8  ;;  %v446_v25 = vrot.slane %v1321_v11, 1  ;;  %534 = vst [vmem:[#allocation2] sm:$0x1] %v533_v36  ;;  %v538_v38 = vsel %vm536_vm8, 0, %v537_v35  ;;  %v1332_v39 = vld [vmem:[#allocation6 + $0x18] sm:$0xff]   ;;  %vm569_vm11 = vmand %vm568_vm9, %vm535_vm7 }
  0x58   : > { %v284_v13 = vshrl.u32 %v1050_v10, 16  ;;  %v286_v14 = vshll.u32 %v1050_v10, 16  ;;  %539 = vst [vmem:[#allocation2 + $0x8] sm:$0x1] %v538_v38  ;;  %v1333_v40 = vld [vmem:[#allocation6 + $0x50] sm:$0xff]   ;;  %v1334_v41 = vld [vmem:[#allocation6 + $0x20] sm:$0xff]   ;;  %vm547_vm12 = vmor %vm530_vm5, %vm546_vm10 }
  0x59   : > { %1154 = vmatpush3.bf16.msra.mxu0 %v1316_v5  ;;  %1166 = vmatpush3.bf16.msra.mxu1 %v1317_v6  ;;  %v293_v17 = vrot.slane %v291_v15, 1  ;;  %v445_v24 = vrot.slane %v1062_v21, 1  ;;  %v1335_v42 = vld [vmem:[#allocation6 + $0x58] sm:$0xff]   ;;  %v1336_v43 = vld [vmem:[#allocation6 + $0x28] sm:$0xff]   ;;  %v1337_v44 = vld [vmem:[#allocation6 + $0x60] sm:$0xff]   ;;  %s956_s17 = sshll.u32 %s247_s16, 4  ;;  %s1721_s17 = int_to_ptr.vmem [resolvable:$true] %s956_s17 }
  0x5a   : > { %1155 = vmatprep.subr.bf16.mxu0 %v1486_v0  ;;  %1167 = vmatprep.subr.bf16.mxu1 %v1486_v0  ;;  %v288_v16 = vrot.slane %v286_v14, 1  ;;  %v1338_v45 = vld [vmem:[#allocation6 + $0x30] sm:$0xff]   ;;  %v1339_v46 = vld [vmem:[#allocation6 + $0x68] sm:$0xff]   ;;  %v1340_v47 = vld [vmem:[#allocation6 + $0x38] sm:$0xff]   ;;  %s1106_s7 = sshll.u32 %s1542_s22, 8  ;;  %s1728_s8 = scalar_lea.sflag [#allocation5], %s245_s12 }
  0x5b   : > { %v447_v28 = vsel %vm444_vm3, %v445_v24, %v446_v25  ;;  %v1341_v48 = vld [vmem:[#allocation6 + $0x70] sm:$0xff]   ;;  %v1343_v49 = vld [vmem:[#allocation6 + $0x78] sm:$0xff]   ;;  %v1345_v36 = vld [vmem:[#allocation6 + $0x80] sm:$0xff]   ;;  %s1726_s30 = scalar_lea.hbm %s1774_s5, %s1106_s7  ;;  %s1410_s10 = scalar_lea.vmem %s1721_s17, 256 }
  0x5c   : > { %v289_v20 = vor.u32 %v288_v16, %v284_v13  ;;  %v1068_v61 = vld [vmem:[%s1771_s2] ss:$0 sm:$0xff]  ;;  %v1346_v33 = vld [vmem:[#allocation6 + $0x88] sm:$0xff]   ;;  %p1411_p12 = scmp.ne.s32.totalorder %s1721_s17, %s1410_s10  ;;  %p1789_p1 = scmp.ne.s32.totalorder %s1778_s28, 0 }
  0x5d   : > { %1156 = vmatpush3.bf16.msra.mxu0 %v1318_v9  ;;  %1168 = vmatpush3.bf16.msra.mxu1 %v1319_v12  ;;  %v1347_v38 = vld [vmem:[#allocation6 + $0x90] sm:$0xff]   ;;  %s1488_s22 = smov [#allocation8]  }
  0x5e   : > { %1173 = vmatprep.subr.bf16.mxu0 %v1486_v0  ;;  %1185 = vmatprep.subr.bf16.mxu1 %v1486_v0  ;;  %v294_v22 = vsel %vm282_vm1, %v289_v20, %v293_v17  ;;  %v570_v14 = vld [vmem:[#allocation2] sm:$0xf]  ;;  %p1412_p2 = pnand %p1411_p12, %p1789_p1  ;;  %s1414_s25 = sshll.u32 %s1488_s22, 4  ;;  %s1415_s25 = int_to_ptr.vmem [resolvable:$false] %s1414_s25 }
  0x5f   : > { %s1416_s26 = scalar_lea.vmem %s1415_s25, 512  ;;  %p1417_p4 = scmp.lt.s32.totalorder %s1721_s17, %s1415_s25 }
  0x60   : > { %1158 = vmatmul.mubr.msk.bf16.vlgmr.msra.gmra.mrb[0].mxu0 %vm319_vm2, %v294_v22  ;;  %1170 = vmatmul.mubr.msk.bf16.vlgmr.msra.gmra.mrb[0].mxu1 %vm319_vm2, %v1050_v10  ;;  %p1413_p3 = pneg %p1412_p2  ;;  %p1418_p7 = scmp.lt.s32.totalorder %s1416_s26, %s1410_s10 }
  0x61   : > { %1174 = vmatpush3.bf16.msra.mxu0 %v1322_v18  ;;  %1181 = vmatprep.mubr.msk.bf16.mxu0 %vm1487_vm0, %v1486_v0  ;;  %v574_v18 = vld [vmem:[#allocation2 + $0x8] sm:$0x1] }
  0x62   : > { %1175 = vmatprep.subr.bf16.mxu0 %v1486_v0  ;;  %1201 = vmatprep.mubr.msk.bf16.mxu1 %vm1487_vm0, %v1486_v0  ;;  %p1419_p8 = por %p1418_p7, %p1417_p4 }
  0x63   : > { %1186 = vmatpush3.bf16.msra.mxu1 %v1329_v31 }
  0x64   : > { %1187 = vmatprep.subr.bf16.mxu1 %v1486_v0  ;;  %p1420_p11 = pnand %p1419_p8, %p1413_p3 }
  0x65   : > { %1176 = vmatpush3.bf16.msra.mxu0 %v1323_v23 }
  0x66   : > { %1177 = vmatprep.subr.bf16.mxu0 %v1486_v0 }
  0x67   : > { %1188 = vmatpush3.bf16.msra.mxu1 %v1331_v37 }
  0x68   : > { %1189 = vmatprep.subr.bf16.mxu1 %v1486_v0 }
  0x69   : > { %1178 = vmatpush3.bf16.msra.mxu0 %v1324_v26 }
  0x6a   : > { %1179 = vmatprep.subr.bf16.mxu0 %v1486_v0 }
  0x6b   : > { %1190 = vmatpush3.bf16.msra.mxu1 %v1333_v40  ;;  %v1349_v40 = vld [vmem:[#allocation6 + $0xa0] sm:$0xff]  }
  0x6c   : > { %1191 = vmatprep.subr.bf16.mxu1 %v1486_v0 }
  0x6d   : > { %1180 = vmatpush3.bf16.msra.mxu0 %v1325_v27 }
  0x6e   : > { %1205 = vmatprep.subr.bf16.mxu0 %v1486_v0 }
  0x6f   : > { %1192 = vmatpush3.bf16.msra.mxu1 %v1335_v42  ;;  %v1351_v42 = vld [vmem:[#allocation6 + $0xb0] sm:$0xff]  }
  0x70   : > { %1182 = vmatmul.mubr.msk.bf16.vlgmr.msra.gmra.mrb[4].mxu0 %vm319_vm2, %v447_v28  ;;  %1193 = vmatprep.subr.bf16.mxu1 %v1486_v0 }
  0x71   : > { %1221 = vmatprep.mubr.msk.bf16.mxu0 %vm1487_vm0, %v1486_v0  ;;  %1206 = vmatpush3.bf16.msra.mxu0 %v1327_v29 }
  0x72   : > { %1207 = vmatprep.subr.bf16.mxu0 %v1486_v0 }
  0x73   : > { %1194 = vmatpush3.bf16.msra.mxu1 %v1337_v44 }
  0x74   : > { %1195 = vmatprep.subr.bf16.mxu1 %v1486_v0 }
  0x75   : > { %1208 = vmatpush3.bf16.msra.mxu0 %v1328_v30 }
  0x76   : > { %1209 = vmatprep.subr.bf16.mxu0 %v1486_v0 }
  0x77   : > { %1196 = vmatpush3.bf16.msra.mxu1 %v1339_v46 }
  0x78   : > { %1197 = vmatprep.subr.bf16.mxu1 %v1486_v0 }
  0x79   : > { %1210 = vmatpush3.bf16.msra.mxu0 %v1330_v32 }
  0x7a   : > { %1211 = vmatprep.subr.bf16.mxu0 %v1486_v0 }
  0x7b   : > { %1198 = vmatpush3.bf16.msra.mxu1 %v1341_v48 }
  0x7c   : > { %1199 = vmatprep.subr.bf16.mxu1 %v1486_v0 }
  0x7d   : > { %1212 = vmatpush3.bf16.msra.mxu0 %v1332_v39  ;;  %v1348_v39 = vld [vmem:[#allocation6 + $0x98] sm:$0xff]  }
  0x7e   : > { %1213 = vmatprep.subr.bf16.mxu0 %v1486_v0 }
  0x7f   : > { %1200 = vmatpush3.bf16.msra.mxu1 %v1343_v49 }
  0x80   : > { %1225 = vmatprep.subr.bf16.mxu1 %v1486_v0 }
  0x81   : > { %1214 = vmatpush3.bf16.msra.mxu0 %v1334_v41  ;;  %v1350_v41 = vld [vmem:[#allocation6 + $0xa8] sm:$0xff]  }
  0x82   : > { %1215 = vmatprep.subr.bf16.mxu0 %v1486_v0 }
  0x85   : > { %1216 = vmatpush3.bf16.msra.mxu0 %v1336_v43 }
  0x86   : > { %1217 = vmatprep.subr.bf16.mxu0 %v1486_v0 }
  0x89   : > { %1218 = vmatpush3.bf16.msra.mxu0 %v1338_v45  ;;  %v1352_v45 = vld [vmem:[#allocation6 + $0xb8] sm:$0xff]  }
  0x8a   : > { %1219 = vmatprep.subr.bf16.mxu0 %v1486_v0 }
  0x8d   : > { %1220 = vmatpush3.bf16.msra.mxu0 %v1340_v47 }
 0x133   : > { %v357_v50 = vpop.f32.mrb[0].mxu0  ;;  %v424_v51 = vpop.f32.mrb[0].mxu1 }
 0x134   : > { %v425_v52 = vadd.f32 %v424_v51, %v357_v50  ;;  %v1159_v53 = vpop.f32.mrb[1].mxu0  ;;  %v1171_v54 = vpop.f32.mrb[1].mxu1 }
 0x135   : > { %v360_v55 = vpop.f32.mrb[2].mxu0  ;;  %v427_v56 = vpop.f32.mrb[2].mxu1 }
 0x136   : > { %v428_v57 = vadd.f32 %v427_v56, %v360_v55  ;;  %v1160_v58 = vpop.f32.mrb[3].mxu0  ;;  %v1172_v59 = vpop.f32.mrb[3].mxu1 }
 0x137   : > { %v1098_v59 = vld [vmem:[%s1773_s4] ss:$0 sm:$0xff] }
 0x143   : > { %v509_v60 = vpop.f32.mrb[4].mxu0 }
 0x144   : > { %v516_v62 = vadd.f32 %v509_v60, %v425_v52  ;;  %v1183_v63 = vpop.f32.mrb[5].mxu0 }
 0x145   : > { %v512_v1 = vpop.f32.mrb[6].mxu0 }
 0x146   : > { %v525_v2 = vadd.f32 %v1068_v61, %v516_v62  ;;  %v517_v3 = vadd.f32 %v512_v1, %v428_v57  ;;  %v1184_v4 = vpop.f32.mrb[7].mxu0 }
 0x148   : > { %v527_v5 = vmax.f32 %v525_v2, 0.0  ;;  %v526_v6 = vadd.f32 %v1068_v61, %v517_v3 }
 0x14a   : > { %v1104_v7 = vpack.c.bf16 %v527_v5, %v527_v5  ;;  %v528_v8 = vmax.f32 %v526_v6, 0.0 }
 0x14c   : > { %v549_v9 = vshrl.u32 %v1104_v7, 16  ;;  %v1105_v10 = vpack.c.bf16 %v528_v8, %v528_v8  ;;  %v552_v12 = vshll.u32 %v1104_v7, 16 }
 0x14e   : > { %v551_v11 = vrot.slane %v549_v9, 7  ;;  %v557_v13 = vshrl.u32 %v1105_v10, 16  ;;  %v560_v17 = vshll.u32 %v1105_v10, 16 }
 0x150   : > { %v554_v15 = vor.u32 %v552_v12, %v551_v11  ;;  %v559_v16 = vrot.slane %v557_v13, 7  ;;  %v555_v19 = vrot.slane %v551_v11, 4 }
 0x152   : > { %v571_v20 = vsel %vm569_vm11, %v554_v15, %v570_v14  ;;  %v562_v21 = vor.u32 %v560_v17, %v559_v16  ;;  %v564_v22 = vrot.slane %v559_v16, 4 }
 0x153   : > { %572 = vst [vmem:[#allocation2] sm:$0xf] %v571_v20 }
 0x154   : > { %v563_v23 = vsel %vm547_vm12, %v555_v19, %v562_v21  ;;  %v575_v24 = vsel %vm1679_vm6, %v564_v22, %v574_v18 }
 0x155   : > { %573 = vst [vmem:[#allocation2 + $0x4] sm:$0xf] %v563_v23  ;;  %576 = vst [vmem:[#allocation2 + $0x8] sm:$0x1] %v575_v24 }
 0x15a   : > { %v577_v25 = vld [vmem:[#allocation2] sm:$0xf] }
 0x15b   : > { %v813_v43 = vld [vmem:[#allocation2] sm:$0xe] }
 0x15c   : > { %v578_v26 = vld [vmem:[#allocation2 + $0x4] sm:$0xf]  ;;  %v1344_v28 = vld [vmem:[#allocation2 + $0x8] ss:$0 sps:$4 sm:$0x11]  }
 0x15d   : > { %v1071_v27 = vcombine.low %v577_v25, %v578_v26  ;;  %v629_v30 = vshll.u32 %v1344_v28, 16  ;;  %v1089_v44 = vcombine.low %v813_v43, %v578_v26  ;;  %v835_v47 = vrot.slane %v1344_v28, 1 }
 0x15f   : > { %1222 = vmatmul.mubr.bf16.vlgmr.msra.gmra.mrb[8].mxu0 %v1071_v27  ;;  %v624_v29 = vshll.u32 %v1071_v27, 16  ;;  %v622_v31 = vshrl.u32 %v1071_v27, 16  ;;  %v631_v35 = vrot.slane %v629_v30, 1  ;;  %v834_v46 = vrot.slane %v1089_v44, 1 }
 0x161   : > { %v626_v32 = vrot.slane %v624_v29, 1  ;;  %v836_v48 = vsel %vm444_vm3, %v834_v46, %v835_v47 }
 0x163   : > { %v627_v34 = vor.u32 %v626_v32, %v622_v31 }
 0x165   : > { %v632_v37 = vsel %vm282_vm1, %v627_v34, %v631_v35 }
 0x166   : > { %1202 = vmatmul.mubr.bf16.vlgmr.msra.gmra.mrb[4].mxu1 %v632_v37 }
 0x167   : > { %1226 = vmatpush3.bf16.msra.mxu1 %v1345_v36  ;;  %1241 = vmatprep.mubr.msk.bf16.mxu1 %vm1487_vm0, %v1486_v0 }
 0x168   : > { %1227 = vmatprep.subr.bf16.mxu1 %v1486_v0 }
 0x16b   : > { %1228 = vmatpush3.bf16.msra.mxu1 %v1346_v33 }
 0x16c   : > { %1229 = vmatprep.subr.bf16.mxu1 %v1486_v0 }
 0x16f   : > { %1230 = vmatpush3.bf16.msra.mxu1 %v1347_v38 }
 0x170   : > { %1231 = vmatprep.subr.bf16.mxu1 %v1486_v0 }
 0x173   : > { %1232 = vmatpush3.bf16.msra.mxu1 %v1348_v39 }
 0x174   : > { %1233 = vmatprep.subr.bf16.mxu1 %v1486_v0 }
 0x177   : > { %1234 = vmatpush3.bf16.msra.mxu1 %v1349_v40 }
 0x178   : > { %1235 = vmatprep.subr.bf16.mxu1 %v1486_v0 }
 0x17b   : > { %1236 = vmatpush3.bf16.msra.mxu1 %v1350_v41 }
 0x17c   : > { %1237 = vmatprep.subr.bf16.mxu1 %v1486_v0 }
 0x17f   : > { %1238 = vmatpush3.bf16.msra.mxu1 %v1351_v42 }
 0x180   : > { %1239 = vmatprep.subr.bf16.mxu1 %v1486_v0 }
 0x183   : > { %1240 = vmatpush3.bf16.msra.mxu1 %v1352_v45 }
 0x186   : > { %1242 = vmatmul.mubr.bf16.vlgmr.msra.gmra.mrb[8].mxu1 %v836_v48 }
 0x232   : > { %v806_v49 = vpop.f32.mrb[8].mxu0 }
 0x233   : > { %v1223_v50 = vpop.f32.mrb[9].mxu0 }
 0x234   : > { %v809_v51 = vpop.f32.mrb[10].mxu0 }
 0x235   : > { %v1224_v52 = vpop.f32.mrb[11].mxu0 }
 0x239   : > { %v716_v53 = vpop.f32.mrb[4].mxu1 }
 0x23a   : > { %v807_v54 = vadd.f32 %v806_v49, %v716_v53  ;;  %v1203_v55 = vpop.f32.mrb[5].mxu1 }
 0x23b   : > { %v719_v56 = vpop.f32.mrb[6].mxu1 }
 0x23c   : > { %v810_v57 = vadd.f32 %v809_v51, %v719_v56  ;;  %v1204_v58 = vpop.f32.mrb[7].mxu1 }
 0x259   : > { %v920_v0 = vpop.f32.mrb[8].mxu1 }
 0x25a   : > { %v927_v60 = vadd.f32 %v920_v0, %v807_v54  ;;  %v1243_v61 = vpop.f32.mrb[9].mxu1 }
 0x25b   : > { %v923_v62 = vpop.f32.mrb[10].mxu1 }
 0x25c   : > { %v936_v63 = vadd.f32 %v1098_v59, %v927_v60  ;;  %v928_v1 = vadd.f32 %v923_v62, %v810_v57  ;;  %v1244_v2 = vpop.f32.mrb[11].mxu1 }
 0x25e   : > { %v938_v3 = vmax.f32 %v936_v63, 0.0  ;;  %v937_v4 = vadd.f32 %v1098_v59, %v928_v1 }
 0x260   : > { %940 = vst [vmem:[%s247_s16] sm:$0xff] %v938_v3  ;;  %v939_v5 = vmax.f32 %v937_v4, 0.0 }
 0x262   : > { %941 = vst [vmem:[%s247_s16 + $0x8] sm:$0xff] %v939_v5 }
 0x263   : > { %1423 = shalt.err (!%p1420_p11)
}
 0x264   : > { %s1424_s9 = scalar_lea.hbm %s1726_s30, 256  ;;  %s1428_s13 = scalar_lea.hbm %s1774_s5, 512 }
 0x265   : > { %p1425_p13 = scmp.ne.s32.totalorder %s1726_s30, %s1424_s9  ;;  %p1429_p6 = scmp.lt.u32.totalorder %s1726_s30, %s1774_s5 }
 0x266   : > { %p1430_p9 = scmp.lt.u32.totalorder %s1428_s13, %s1424_s9  ;;  %p1432_p12 = scmp.lt.u32.totalorder %s1424_s9, %s1726_s30 }
 0x267   : > { %p1426_p5 = pnand %p1425_p13, %p1789_p1 }
 0x268   : > { %p1431_p10 = por %p1430_p9, %p1429_p6 }
 0x269   : > { %p1427_p0 = pneg %p1426_p5 }
 0x26a   : > { %p1433_p2 = por %p1432_p12, %p1431_p10 }
 0x26c   : > { %p1434_p3 = pnand %p1433_p2, %p1427_p0 }
 0x26e   : > { %1437 = shalt.err (!%p1434_p3)
}
 0x26f   : > { %s1489_s16 = smov 128   ;;  %s1490_s7 = smov 8  }
 0x270   : > { %1254 = dma.vmem_to_hbm [thread:$0]  (%p1789_p1), %s1721_s17, 256, %s1726_s30, %s1728_s8, %s1489_s16, %s1489_s16, %s1490_s7  }
 0x271 PF: > { %p1271_p4 = scmp.ge.s32.totalorder %s1480_s21, 2  ;;  %s971_s23 = sand.u32 1, %s1468_s18  }
 0x272   : > { %p1790_p7 = scmp.ne.s32.totalorder %s1779_s29, 0  ;;  %s972_s6 = scalar_lea.sflag [#allocation5], %s971_s23 }
 0x274   : > { %p1264_p8 = pnand %p1271_p4, %p1790_p7 }
 0x276   : > { %1463 = dma.done.wait (!%p1264_p8), %s972_s6, 256  }
 0x277   : > { %1465 = vsyncadd (!%p1264_p8), %s972_s6, 4294967040  ;;  %p17_p11 = scmp.ge.s32.totalorder %s1546_s24, 4   ;;  %s1791_s18 = smov %s1472_s19 }
 0x278   : > { %s1792_s19 = smov %s1476_s20  ;;  %s1793_s20 = smov %s1557_s27 }
 0x279   : > { %s1794_s21 = smov %s1546_s24  ;;  %19 = sbr.rel (!%p17_p11) target bundleno = 5 (0x5), region = 88 }
 0x280   :  { %977 = vsyncpa [#allocation4], 1 }
 0x281   :  { %979 = vsyncpa [#allocation4 + $0x1], 1 }
 0x282   :  { %980 = vsyncpa [#allocation7], 1 }
 0x283   :  { %981 = vsyncpa [#allocation5], 1 }
 0x284   :  { %983 = vsyncpa [#allocation5 + $0x1], 1 }

</bundles_post_ra>
